<compile_context>
chip_gen: v6e
topology: v6e:2x2x1
jax: 0.10.0
libtpu: 0.0.40
codegen_flags: <defaults>
</compile_context>

<pallas_src>
import functools

import jax
import jax.numpy as jnp
from jax import lax
from jax.experimental import pallas as pl
from jax.experimental.pallas import tpu as pltpu


# ----------------------------- fused kernel -----------------------------------
def _fused_conv_lrelu_bn_kernel(p_ref, w_ref, b_ref, g_ref, be_ref,
                                o_ref, sum_sc, sq_sc, *,
                                inv_m, eps, tm, m_valid, needs_mask):
    """One grid step = one tile of tm output pixels.

    p_ref : (Kp, tm)  bf16   im2col patch columns for this tile
    w_ref : (Cout, Kp) bf16  flattened conv weights (resident)
    b/g/be: (Cout, 1) f32    conv bias, BN gamma, BN beta (resident)
    o_ref : (G, Cout, tm) f32  full output slab, resident (constant block index)
    sum_sc/sq_sc: (Cout, 1) f32  per-channel running sum / sum-of-squares
    """
    i = pl.program_id(0)

    @pl.when(i == 0)
    def _init():
        sum_sc[...] = jnp.zeros_like(sum_sc)
        sq_sc[...] = jnp.zeros_like(sq_sc)

    # conv tile on the MXU: (Cout, Kp) @ (Kp, tm) -> (Cout, tm), f32 accumulate
    y = jnp.dot(w_ref[...], p_ref[...], preferred_element_type=jnp.float32)
    y = y + b_ref[...]                         # conv bias (lane broadcast)
    y = jnp.where(y >= 0.0, y, 0.2 * y)        # LeakyReLU(negative_slope=0.2)

    # per-channel partial sums for the batch-norm statistics
    if needs_mask:
        # remainder tile: exclude zero-padded pixel columns from the statistics
        col = i * tm + lax.broadcasted_iota(jnp.int32, (1, tm), 1)
        valid = (col < m_valid).astype(jnp.float32)
        sum_sc[...] += jnp.sum(y * valid, axis=1, keepdims=True)
        sq_sc[...] += jnp.sum(y * y * valid, axis=1, keepdims=True)
    else:
        sum_sc[...] += jnp.sum(y, axis=1, keepdims=True)
        sq_sc[...] += jnp.sum(y * y, axis=1, keepdims=True)

    # stash pre-norm activations in the resident output slab (lane-dense store)
    o_ref[i] = y

    @pl.when(i == pl.num_programs(0) - 1)
    def _finalize():
        # training-mode BatchNorm: biased variance over the true pixel count
        mean = sum_sc[...] * inv_m                       # (Cout, 1)
        var = sq_sc[...] * inv_m - mean * mean           # E[y^2] - mean^2
        scale = g_ref[...] * lax.rsqrt(var + eps)        # (Cout, 1)
        shift = be_ref[...] - mean * scale               # (Cout, 1)
        o_ref[...] = (o_ref[...] * scale[jnp.newaxis, :, :]
                      + shift[jnp.newaxis, :, :])


# ----------------------------- wrapper -----------------------------------------
def discriminator_block_forward(x_nchw, weight, bias, gamma, beta, *,
                                stride=2, pad=1, eps=1e-5):
    N, Cin, H, W = x_nchw.shape
    Cout, _, Kh, Kw = weight.shape
    Ho = (H + 2 * pad - Kh) // stride + 1
    Wo = (W + 2 * pad - Kw) // stride + 1
    M = N * Ho * Wo                 # number of output pixels
    K = Cin * Kh * Kw               # contraction depth

    # ---- glue: single fused im2col gather (one XLA conv op) --------------------
    # Output: (N, Cin*Kh*Kw, Ho, Wo); feature ordering (cin, kh, kw), which matches
    # PyTorch OIHW weight.reshape(Cout, Cin*Kh*Kw). bf16 extraction is exact.
    patches = lax.conv_general_dilated_patches(
        x_nchw.astype(jnp.bfloat16),
        filter_shape=(Kh, Kw),
        window_strides=(stride, stride),
        padding=((pad, pad), (pad, pad)),
        dimension_numbers=('NCHW', 'OIHW', 'NCHW'))
    p_T = jnp.transpose(patches, (1, 0, 2, 3)).reshape(K, M)   # (K, M)

    # ---- tile geometry: lane-align K and the pixel tiles to 128 ----------------
    Kp = ((K + 127) // 128) * 128          # 48 -> 128: full MXU contraction depth
    tm = 512                               # rows per tile (big tiles amortize the
    while tm > 128 and M % tm != 0:        # ~0.35us per-grid-step overhead)
        tm //= 2
    G = -(-M // tm)                        # number of tiles
    Mp = G * tm
    needs_mask = (Mp != M)

    p_T = jnp.pad(p_T, ((0, Kp - K), (0, Mp - M)))                       # bf16
    w_T = jnp.pad(weight.astype(jnp.bfloat16).reshape(Cout, K),
                  ((0, 0), (0, Kp - K)))                                 # bf16
    b_col = bias.reshape(Cout, 1).astype(jnp.float32)
    g_col = gamma.reshape(Cout, 1).astype(jnp.float32)
    be_col = beta.reshape(Cout, 1).astype(jnp.float32)

    kern = functools.partial(_fused_conv_lrelu_bn_kernel,
                             inv_m=1.0 / M, eps=eps, tm=tm,
                             m_valid=M, needs_mask=needs_mask)

    # Single fused pass.  The output block index is constant -> the whole
    # (G, Cout, tm) slab stays resident in VMEM and is written back to HBM once.
    # (Resident slab is ~Cout*Mp*4 B; fine well past toy sizes even on v7x's
    #  64 MiB VMEM.  Grid axis is a reduction over statistics -> "arbitrary".)
    out3 = pl.pallas_call(
        kern,
        out_shape=jax.ShapeDtypeStruct((G, Cout, tm), jnp.float32),
        grid_spec=pltpu.PrefetchScalarGridSpec(
            num_scalar_prefetch=0,
            grid=(G,),
            in_specs=[pl.BlockSpec((Kp, tm), lambda i: (0, i)),     # patch tile
                      pl.BlockSpec((Cout, Kp), lambda i: (0, 0)),   # weights
                      pl.BlockSpec((Cout, 1), lambda i: (0, 0)),    # bias
                      pl.BlockSpec((Cout, 1), lambda i: (0, 0)),    # gamma
                      pl.BlockSpec((Cout, 1), lambda i: (0, 0))],   # beta
            out_specs=pl.BlockSpec((G, Cout, tm), lambda i: (0, 0, 0)),
            scratch_shapes=[pltpu.VMEM((Cout, 1), jnp.float32),
                            pltpu.VMEM((Cout, 1), jnp.float32)]),
        compiler_params=pltpu.CompilerParams(
            dimension_semantics=("arbitrary",)),
    )(p_T, w_T, b_col, g_col, be_col)

    # (G, Cout, tm) -> (Cout, M) -> (N, Cout, Ho, Wo): only leading-dim moves,
    # the lane-major (Ho, Wo) layout of each channel is untouched.
    out = jnp.transpose(out3, (1, 0, 2)).reshape(Cout, Mp)[:, :M]
    out = out.reshape(Cout, N, Ho, Wo)
    return jnp.transpose(out, (1, 0, 2, 3))


# ----------------------------- reference (for correctness check) ---------------
def reference_forward(x_nchw, weight, bias, gamma, beta, *,
                      stride=2, pad=1, eps=1e-5):
    # Same math as the PyTorch module in training mode; conv operands cast to
    # bf16 with f32 accumulation to match the kernel's MXU precision (everything
    # else in f32), so the comparison isolates implementation correctness.
    y = lax.conv_general_dilated(
        x_nchw.astype(jnp.bfloat16), weight.astype(jnp.bfloat16),
        window_strides=(stride, stride),
        padding=((pad, pad), (pad, pad)),
        dimension_numbers=('NCHW', 'OIHW', 'NCHW'),
        preferred_element_type=jnp.float32)
    y = y + bias.reshape(1, -1, 1, 1).astype(jnp.float32)
    y = jnp.where(y >= 0.0, y, 0.2 * y)
    mean = jnp.mean(y, axis=(0, 2, 3), keepdims=True)
    var = jnp.mean((y - mean) ** 2, axis=(0, 2, 3), keepdims=True)
    return ((y - mean) / jnp.sqrt(var + eps) * gamma.reshape(1, -1, 1, 1)
            + beta.reshape(1, -1, 1, 1))


if __name__ == "__main__":
    key = jax.random.PRNGKey(0)
    k_x, k_w, k_b = jax.random.split(key, 3)

    N, Cin, H, W = 2, 3, 16, 16
    Cout, Kh, Kw = 64, 4, 4

    x = jax.random.normal(k_x, (N, Cin, H, W), dtype=jnp.float32)
    # deterministic synthetic parameters (shapes per nn.Conv2d / nn.BatchNorm2d)
    weight = jax.random.normal(k_w, (Cout, Cin, Kh, Kw), dtype=jnp.float32) * 0.05
    bias = jax.random.normal(k_b, (Cout,), dtype=jnp.float32) * 0.01
    gamma = jnp.ones((Cout,), dtype=jnp.float32)   # BatchNorm2d default weight
    beta = jnp.zeros((Cout,), dtype=jnp.float32)   # BatchNorm2d default bias

    out = discriminator_block_forward(x, weight, bias, gamma, beta)
    out = jax.block_until_ready(out)

    ref = reference_forward(x, weight, bias, gamma, beta)
    assert out.shape == (N, Cout, H // 2, W // 2), out.shape
    max_err = float(jnp.max(jnp.abs(out - ref)))
    assert max_err < 5e-3, max_err

    print("KERNEL_OK")
</pallas_src>

<mosaic_0001>
module attributes {stable_mosaic.version = 11 : i64} {
  func.func @_fused_conv_lrelu_bn_kernel(%arg0: i32, %arg1: memref<128x128xbf16, #tpu.memory_space<vmem>>, %arg2: memref<64x128xbf16, #tpu.memory_space<vmem>>, %arg3: memref<64x1xf32, #tpu.memory_space<vmem>>, %arg4: memref<64x1xf32, #tpu.memory_space<vmem>>, %arg5: memref<64x1xf32, #tpu.memory_space<vmem>>, %arg6: memref<1x64x128xf32, #tpu.memory_space<vmem>>, %arg7: memref<64x1xf32, #tpu.memory_space<vmem>>, %arg8: memref<64x1xf32, #tpu.memory_space<vmem>>) attributes {dimension_semantics = [#tpu.dimension_semantics<arbitrary>], iteration_bounds = array<i64: 1>, scalar_prefetch = 0 : i64, scratch_operands = 2 : i64, tpu.core_type = #tpu.core_type<tc>, window_params = [{transform_indices = @transform_0, window_bounds = array<i64: 128, 128>}, {pipeline_mode = #tpu.pipeline_mode<synchronous>, transform_indices = @transform_1, window_bounds = array<i64: 64, 128>}, {pipeline_mode = #tpu.pipeline_mode<synchronous>, transform_indices = @transform_2, window_bounds = array<i64: 64, 1>}, {pipeline_mode = #tpu.pipeline_mode<synchronous>, transform_indices = @transform_3, window_bounds = array<i64: 64, 1>}, {pipeline_mode = #tpu.pipeline_mode<synchronous>, transform_indices = @transform_4, window_bounds = array<i64: 64, 1>}, {pipeline_mode = #tpu.pipeline_mode<synchronous>, transform_indices = @transform_5, window_bounds = array<i64: 1, 64, 128>}]} {
    %c0_i32 = arith.constant 0 : i32
    %0 = arith.cmpi eq, %arg0, %c0_i32 : i32
    %1 = arith.extui %0 : i1 to i32
    %c0_i32_0 = arith.constant 0 : i32
    %2 = arith.cmpi ne, %1, %c0_i32_0 : i32
    scf.if %2 {
      %cst_22 = arith.constant 0.000000e+00 : f32
      %32 = vector.broadcast %cst_22 : f32 to vector<64x1xf32>
      %c0_23 = arith.constant 0 : index
      %c0_24 = arith.constant 0 : index
      %33 = vector.load %arg7[%c0_23, %c0_24] : memref<64x1xf32, #tpu.memory_space<vmem>>, vector<64x1xf32>
      tpu.vector_store %arg7[%c0_23, %c0_24], %32 {strides = array<i32>} : memref<64x1xf32, #tpu.memory_space<vmem>>, vector<64x1xf32>,
      %cst_25 = arith.constant 0.000000e+00 : f32
      %34 = vector.broadcast %cst_25 : f32 to vector<64x1xf32>
      %c0_26 = arith.constant 0 : index
      %c0_27 = arith.constant 0 : index
      %35 = vector.load %arg8[%c0_26, %c0_27] : memref<64x1xf32, #tpu.memory_space<vmem>>, vector<64x1xf32>
      tpu.vector_store %arg8[%c0_26, %c0_27], %34 {strides = array<i32>} : memref<64x1xf32, #tpu.memory_space<vmem>>, vector<64x1xf32>,
    } else {
    }
    %c0 = arith.constant 0 : index
    %c0_1 = arith.constant 0 : index
    %3 = vector.load %arg2[%c0, %c0_1] : memref<64x128xbf16, #tpu.memory_space<vmem>>, vector<64x128xbf16>
    %c0_2 = arith.constant 0 : index
    %c0_3 = arith.constant 0 : index
    %4 = vector.load %arg1[%c0_2, %c0_3] : memref<128x128xbf16, #tpu.memory_space<vmem>>, vector<128x128xbf16>
    %cst = arith.constant dense<0.000000e+00> : vector<64x128xf32>
    %5 = tpu.matmul %3, %4, %cst {dimension_numbers = #tpu.dot_dimension_numbers<[1], [0], [0], [1], [0, 0, 1, 1], [], []>} : vector<64x128xbf16>, vector<128x128xbf16>, vector<64x128xf32> -> vector<64x128xf32>
    %c0_4 = arith.constant 0 : index
    %c0_5 = arith.constant 0 : index
    %6 = vector.load %arg3[%c0_4, %c0_5] : memref<64x1xf32, #tpu.memory_space<vmem>>, vector<64x1xf32>
    %7 = vector.broadcast %6 : vector<64x1xf32> to vector<64x128xf32>
    %8 = arith.addf %5, %7 : vector<64x128xf32>
    %cst_6 = arith.constant 0.000000e+00 : f32
    %9 = vector.broadcast %cst_6 : f32 to vector<64x128xf32>
    %10 = arith.cmpf oge, %8, %9 : vector<64x128xf32>
    %cst_7 = arith.constant 2.000000e-01 : f32
    %11 = vector.broadcast %cst_7 : f32 to vector<64x128xf32>
    %12 = arith.mulf %11, %8 : vector<64x128xf32>
    %13 = arith.select %10, %8, %12 : vector<64x128xi1>, vector<64x128xf32>
    %c0_8 = arith.constant 0 : index
    %c0_9 = arith.constant 0 : index
    %14 = vector.load %arg7[%c0_8, %c0_9] : memref<64x1xf32, #tpu.memory_space<vmem>>, vector<64x1xf32>
    %cst_10 = arith.constant dense<0.000000e+00> : vector<64xf32>
    %15 = vector.multi_reduction <add>, %13, %cst_10 [1] : vector<64x128xf32> to vector<64xf32>
    %16 = vector.shape_cast %15 : vector<64xf32> to vector<64x1xf32>
    %17 = arith.addf %14, %16 : vector<64x1xf32>
    %c0_11 = arith.constant 0 : index
    %c0_12 = arith.constant 0 : index
    %18 = vector.load %arg7[%c0_11, %c0_12] : memref<64x1xf32, #tpu.memory_space<vmem>>, vector<64x1xf32>
    tpu.vector_store %arg7[%c0_11, %c0_12], %17 {strides = array<i32>} : memref<64x1xf32, #tpu.memory_space<vmem>>, vector<64x1xf32>,
    %c0_13 = arith.constant 0 : index
    %c0_14 = arith.constant 0 : index
    %19 = vector.load %arg8[%c0_13, %c0_14] : memref<64x1xf32, #tpu.memory_space<vmem>>, vector<64x1xf32>
    %20 = arith.mulf %13, %13 : vector<64x128xf32>
    %cst_15 = arith.constant dense<0.000000e+00> : vector<64xf32>
    %21 = vector.multi_reduction <add>, %20, %cst_15 [1] : vector<64x128xf32> to vector<64xf32>
    %22 = vector.shape_cast %21 : vector<64xf32> to vector<64x1xf32>
    %23 = arith.addf %19, %22 : vector<64x1xf32>
    %c0_16 = arith.constant 0 : index
    %c0_17 = arith.constant 0 : index
    %24 = vector.load %arg8[%c0_16, %c0_17] : memref<64x1xf32, #tpu.memory_space<vmem>>, vector<64x1xf32>
    tpu.vector_store %arg8[%c0_16, %c0_17], %23 {strides = array<i32>} : memref<64x1xf32, #tpu.memory_space<vmem>>, vector<64x1xf32>,
    %25 = arith.index_cast %arg0 : i32 to index
    %c0_18 = arith.constant 0 : index
    %c0_19 = arith.constant 0 : index
    %26 = vector.load %arg6[%25, %c0_18, %c0_19] : memref<1x64x128xf32, #tpu.memory_space<vmem>>, vector<1x64x128xf32>
    %27 = vector.shape_cast %26 : vector<1x64x128xf32> to vector<64x128xf32>
    %28 = vector.shape_cast %13 : vector<64x128xf32> to vector<1x64x128xf32>
    tpu.vector_store %arg6[%25, %c0_18, %c0_19], %28 {strides = array<i32>} : memref<1x64x128xf32, #tpu.memory_space<vmem>>, vector<1x64x128xf32>,
    %c0_i32_20 = arith.constant 0 : i32
    %29 = arith.cmpi eq, %arg0, %c0_i32_20 : i32
    %30 = arith.extui %29 : i1 to i32
    %c0_i32_21 = arith.constant 0 : i32
    %31 = arith.cmpi ne, %30, %c0_i32_21 : i32
    scf.if %31 {
      %c0_22 = arith.constant 0 : index
      %c0_23 = arith.constant 0 : index
      %32 = vector.load %arg7[%c0_22, %c0_23] : memref<64x1xf32, #tpu.memory_space<vmem>>, vector<64x1xf32>
      %cst_24 = arith.constant 7.812500e-03 : f32
      %33 = vector.broadcast %cst_24 : f32 to vector<64x1xf32>
      %34 = arith.mulf %32, %33 : vector<64x1xf32>
      %c0_25 = arith.constant 0 : index
      %c0_26 = arith.constant 0 : index
      %35 = vector.load %arg8[%c0_25, %c0_26] : memref<64x1xf32, #tpu.memory_space<vmem>>, vector<64x1xf32>
      %cst_27 = arith.constant 7.812500e-03 : f32
      %36 = vector.broadcast %cst_27 : f32 to vector<64x1xf32>
      %37 = arith.mulf %35, %36 : vector<64x1xf32>
      %38 = arith.mulf %34, %34 : vector<64x1xf32>
      %39 = arith.subf %37, %38 : vector<64x1xf32>
      %c0_28 = arith.constant 0 : index
      %c0_29 = arith.constant 0 : index
      %40 = vector.load %arg4[%c0_28, %c0_29] : memref<64x1xf32, #tpu.memory_space<vmem>>, vector<64x1xf32>
      %cst_30 = arith.constant 9.99999974E-6 : f32
      %41 = vector.broadcast %cst_30 : f32 to vector<64x1xf32>
      %42 = arith.addf %39, %41 : vector<64x1xf32>
      %43 = math.rsqrt %42 : vector<64x1xf32>
      %44 = arith.mulf %40, %43 : vector<64x1xf32>
      %c0_31 = arith.constant 0 : index
      %c0_32 = arith.constant 0 : index
      %45 = vector.load %arg5[%c0_31, %c0_32] : memref<64x1xf32, #tpu.memory_space<vmem>>, vector<64x1xf32>
      %46 = arith.mulf %34, %44 : vector<64x1xf32>
      %47 = arith.subf %45, %46 : vector<64x1xf32>
      %c0_33 = arith.constant 0 : index
      %c0_34 = arith.constant 0 : index
      %c0_35 = arith.constant 0 : index
      %48 = vector.load %arg6[%c0_33, %c0_34, %c0_35] : memref<1x64x128xf32, #tpu.memory_space<vmem>>, vector<1x64x128xf32>
      %49 = vector.shape_cast %44 : vector<64x1xf32> to vector<1x64x1xf32>
      %50 = vector.broadcast %49 : vector<1x64x1xf32> to vector<1x64x128xf32>
      %51 = arith.mulf %48, %50 : vector<1x64x128xf32>
      %52 = vector.shape_cast %47 : vector<64x1xf32> to vector<1x64x1xf32>
      %53 = vector.broadcast %52 : vector<1x64x1xf32> to vector<1x64x128xf32>
      %54 = arith.addf %51, %53 : vector<1x64x128xf32>
      %c0_36 = arith.constant 0 : index
      %c0_37 = arith.constant 0 : index
      %c0_38 = arith.constant 0 : index
      %55 = vector.load %arg6[%c0_36, %c0_37, %c0_38] : memref<1x64x128xf32, #tpu.memory_space<vmem>>, vector<1x64x128xf32>
      tpu.vector_store %arg6[%c0_36, %c0_37, %c0_38], %54 {strides = array<i32>} : memref<1x64x128xf32, #tpu.memory_space<vmem>>, vector<1x64x128xf32>,
    } else {
    }
    return
  }
  func.func @transform_0(%arg0: i32) -> (i32, i32) {
    %c0_i32 = arith.constant 0 : i32
    %c0_i32_0 = arith.constant 0 : i32
    return %c0_i32, %arg0 : i32, i32
  }
  func.func @transform_1(%arg0: i32) -> (i32, i32) {
    %c0_i32 = arith.constant 0 : i32
    %c0_i32_0 = arith.constant 0 : i32
    %c0_i32_1 = arith.constant 0 : i32
    return %c0_i32, %c0_i32_0 : i32, i32
  }
  func.func @transform_2(%arg0: i32) -> (i32, i32) {
    %c0_i32 = arith.constant 0 : i32
    %c0_i32_0 = arith.constant 0 : i32
    %c0_i32_1 = arith.constant 0 : i32
    return %c0_i32, %c0_i32_0 : i32, i32
  }
  func.func @transform_3(%arg0: i32) -> (i32, i32) {
    %c0_i32 = arith.constant 0 : i32
    %c0_i32_0 = arith.constant 0 : i32
    %c0_i32_1 = arith.constant 0 : i32
    return %c0_i32, %c0_i32_0 : i32, i32
  }
  func.func @transform_4(%arg0: i32) -> (i32, i32) {
    %c0_i32 = arith.constant 0 : i32
    %c0_i32_0 = arith.constant 0 : i32
    %c0_i32_1 = arith.constant 0 : i32
    return %c0_i32, %c0_i32_0 : i32, i32
  }
  func.func @transform_5(%arg0: i32) -> (i32, i32, i32) {
    %c0_i32 = arith.constant 0 : i32
    %c0_i32_0 = arith.constant 0 : i32
    %c0_i32_1 = arith.constant 0 : i32
    %c0_i32_2 = arith.constant 0 : i32
    return %c0_i32, %c0_i32_0, %c0_i32_1 : i32, i32, i32
  }
}

</mosaic_0001>

<bundles_post_ra>
// kernel: tpu_custom_call.1
= control target key start
LH: loop header
LB: loop body
LE: loop exit
PB: predicated region body
PF: predicated region fallthrough
CT: control target
= control target key end

     0   :  { %v731_v2 = vmov 0   ;;  %s1000_s0 = inlined_call_operand.vmem [shape: bf16[128,128], index: 0, kind: input, shape index: {}]   ;;  %s1001_s1 = inlined_call_operand.vmem [shape: bf16[64,128], index: 1, kind: input, shape index: {}]   ;;  %s1002_s2 = inlined_call_operand.vmem [shape: f32[64,1], index: 2, kind: input, shape index: {}]   ;;  %s1003_s3 = inlined_call_operand.vmem [shape: f32[64,1], index: 3, kind: input, shape index: {}]   ;;  %s1004_s4 = inlined_call_operand.vmem [shape: f32[64,1], index: 4, kind: input, shape index: {}]   ;;  %s1005_s5 = inlined_call_operand.hbm [shape: f32[1,64,128], index: 5, kind: output, shape index: {}]  }
   0x1   :  { %v681_v0 = vld [vmem:[%s1000_s0 + $0x38] sm:$0xff]   ;;  %v682_v1 = vld [vmem:[%s1000_s0 + $0x30] sm:$0xff]   ;;  %679 = vset.pattern.permute.xlu0 %v731_v2  ;;  %680 = vset.pattern.permute.xlu1 %v731_v2  ;;  %v683_v3 = vld [vmem:[%s1000_s0 + $0x28] sm:$0xff]  }
   0x2   :  { %634 = vmatprep.subr.bf16.mxu0 %v681_v0  ;;  %658 = vmatprep.subr.bf16.mxu1 %v681_v0  ;;  %v684_v4 = vld [vmem:[%s1000_s0 + $0x20] sm:$0xff]   ;;  %v690_v6 = vld [vmem:[%s1001_s1 + $0x10] sm:$0xff]   ;;  %v685_v7 = vld [vmem:[%s1000_s0 + $0x18] sm:$0xff]  }
   0x3   :  { %635 = vmatpush3.bf16.msra.mxu0 %v681_v0  ;;  %666 = vmatpush3.bf16.msra.mxu1 %v681_v0  ;;  %v689_v5 = vld [vmem:[%s1001_s1] sm:$0xff]   ;;  %v69_v9 = vld [vmem:[%s1002_s2 + $0x10] sm:$0xff]  ;;  %v68_v10 = vld [vmem:[%s1002_s2 + $0x8] sm:$0xff] }
   0x4   :  { %636 = vmatprep.subr.bf16.mxu0 %v682_v1  ;;  %659 = vmatprep.subr.bf16.mxu1 %v682_v1  ;;  %v67_v8 = vld [vmem:[%s1002_s2] sm:$0xff] }
   0x5   :  { %650 = vmatprep.mubr.bf16.mxu0 %v689_v5  ;;  %654 = vmatprep.mubr.bf16.mxu1 %v690_v6 }
   0x6   :  { %77 = vperm.xlu0 %679, %v67_v8   ;;  %87 = vperm.xlu1 %680, %v69_v9  }
   0x7   :  { %637 = vmatpush3.bf16.msra.mxu0 %v682_v1  ;;  %667 = vmatpush3.bf16.msra.mxu1 %v682_v1 }
   0x8   :  { %638 = vmatprep.subr.bf16.mxu0 %v683_v3  ;;  %660 = vmatprep.subr.bf16.mxu1 %v683_v3 }
   0xb   :  { %639 = vmatpush3.bf16.msra.mxu0 %v683_v3  ;;  %668 = vmatpush3.bf16.msra.mxu1 %v683_v3 }
   0xc   :  { %640 = vmatprep.subr.bf16.mxu0 %v684_v4  ;;  %661 = vmatprep.subr.bf16.mxu1 %v684_v4 }
   0xd   :  { %10 = vsyncpa [#allocation5], 0  ;;  %v70_v11 = vld [vmem:[%s1002_s2 + $0x18] sm:$0xff]  ;;  %v686_v12 = vld [vmem:[%s1000_s0 + $0x10] sm:$0xff]   ;;  %82 = vperm.xlu0 %679, %v68_v10   ;;  %vm26_vm5 = vcmask 7168   ;;  %v732_v55 = vmov 0.0  }
   0xe   :  { %v71_v13 = vld [vmem:[%s1002_s2 + $0x20] sm:$0xff]  ;;  %92 = vperm.xlu1 %680, %v70_v11   ;;  %v72_v14 = vld [vmem:[%s1002_s2 + $0x28] sm:$0xff]  ;;  %v73_v16 = vld [vmem:[%s1002_s2 + $0x30] sm:$0xff]  ;;  %33 = vst.msk [vmem:[#allocation2 + $0x30] sm:$0xff] %vm26_vm5, %v732_v55 }
   0xf   :  { %641 = vmatpush3.bf16.msra.mxu0 %v684_v4  ;;  %669 = vmatpush3.bf16.msra.mxu1 %v684_v4  ;;  %v687_v15 = vld [vmem:[%s1000_s0 + $0x8] sm:$0xff]   ;;  %v74_v17 = vld [vmem:[%s1002_s2 + $0x38] sm:$0xff]  ;;  %v688_v18 = vld [vmem:[%s1000_s0] sm:$0xff]   ;;  %27 = vst.msk [vmem:[#allocation2] sm:$0xff] %vm26_vm5, %v732_v55 }
  0x10   :  { %642 = vmatprep.subr.bf16.mxu0 %v685_v7  ;;  %662 = vmatprep.subr.bf16.mxu1 %v685_v7  ;;  %v691_v19 = vld [vmem:[%s1001_s1 + $0x8] sm:$0xff]   ;;  %v692_v20 = vld [vmem:[%s1001_s1 + $0x18] sm:$0xff]   ;;  %28 = vst.msk [vmem:[#allocation2 + $0x8] sm:$0xff] %vm26_vm5, %v732_v55  ;;  %29 = vst.msk [vmem:[#allocation2 + $0x10] sm:$0xff] %vm26_vm5, %v732_v55 }
  0x11   :  { %97 = vperm.xlu0 %679, %v71_v13   ;;  %30 = vst.msk [vmem:[#allocation2 + $0x18] sm:$0xff] %vm26_vm5, %v732_v55  ;;  %31 = vst.msk [vmem:[#allocation2 + $0x20] sm:$0xff] %vm26_vm5, %v732_v55 }
  0x12   :  { %102 = vperm.xlu1 %680, %v72_v14   ;;  %32 = vst.msk [vmem:[#allocation2 + $0x28] sm:$0xff] %vm26_vm5, %v732_v55  ;;  %34 = vst.msk [vmem:[#allocation2 + $0x38] sm:$0xff] %vm26_vm5, %v732_v55 }
  0x13   :  { %643 = vmatpush3.bf16.msra.mxu0 %v685_v7  ;;  %670 = vmatpush3.bf16.msra.mxu1 %v685_v7  ;;  %35 = vst.msk [vmem:[#allocation3] sm:$0xff] %vm26_vm5, %v732_v55  ;;  %36 = vst.msk [vmem:[#allocation3 + $0x8] sm:$0xff] %vm26_vm5, %v732_v55 }
  0x14   :  { %644 = vmatprep.subr.bf16.mxu0 %v686_v12  ;;  %663 = vmatprep.subr.bf16.mxu1 %v686_v12  ;;  %37 = vst.msk [vmem:[#allocation3 + $0x10] sm:$0xff] %vm26_vm5, %v732_v55  ;;  %38 = vst.msk [vmem:[#allocation3 + $0x18] sm:$0xff] %vm26_vm5, %v732_v55 }
  0x15   :  { %107 = vperm.xlu0 %679, %v73_v16   ;;  %39 = vst.msk [vmem:[#allocation3 + $0x20] sm:$0xff] %vm26_vm5, %v732_v55  ;;  %40 = vst.msk [vmem:[#allocation3 + $0x28] sm:$0xff] %vm26_vm5, %v732_v55  ;;  %v282_v6 = vld [vmem:[#allocation2 + $0x30] sm:$0xff] }
  0x16   :  { %112 = vperm.xlu1 %680, %v74_v17   ;;  %41 = vst.msk [vmem:[#allocation3 + $0x30] sm:$0xff] %vm26_vm5, %v732_v55  ;;  %42 = vst.msk [vmem:[#allocation3 + $0x38] sm:$0xff] %vm26_vm5, %v732_v55  ;;  %v276_v13 = vld [vmem:[#allocation2] sm:$0xff] }
  0x17   :  { %645 = vmatpush3.bf16.msra.mxu0 %v686_v12  ;;  %671 = vmatpush3.bf16.msra.mxu1 %v686_v12  ;;  %v278_v7 = vld [vmem:[#allocation2 + $0x10] sm:$0xff] }
  0x18   :  { %646 = vmatprep.subr.bf16.mxu0 %v687_v15  ;;  %664 = vmatprep.subr.bf16.mxu1 %v687_v15  ;;  %v280_v12 = vld [vmem:[#allocation2 + $0x20] sm:$0xff] }
  0x1a   :  { %v318_v55 = vld [vmem:[#allocation3 + $0x8] sm:$0xff] }
  0x1b   :  { %647 = vmatpush3.bf16.msra.mxu0 %v687_v15  ;;  %672 = vmatpush3.bf16.msra.mxu1 %v687_v15 }
  0x1c   :  { %648 = vmatprep.subr.bf16.mxu0 %v688_v18  ;;  %665 = vmatprep.subr.bf16.mxu1 %v688_v18 }
  0x1f   :  { %649 = vmatpush3.bf16.msra.mxu0 %v688_v18  ;;  %673 = vmatpush3.bf16.msra.mxu1 %v688_v18  ;;  %v319_v18 = vld [vmem:[#allocation3 + $0x10] sm:$0xff] }
  0x22   :  { %651 = vmatmul.mubr.bf16.vlgmr.msra.gmra.mxu0 %v691_v19  ;;  %655 = vmatmul.mubr.bf16.vlgmr.msra.gmra.mxu1 %v692_v20  ;;  %v279_v19 = vld [vmem:[#allocation2 + $0x18] sm:$0xff] }
  0x81   :  { %v78_v21 = vpop.permute.xlu0 %77  ;;  %v88_v23 = vpop.permute.xlu1 %87 }
  0x88   :  { %v826_v22 = vpop.permute.xlu0 %82 }
  0x89   :  { %v93_v25 = vpop.permute.xlu1 %92 }
  0x8c   :  { %v98_v24 = vpop.permute.xlu0 %97 }
  0x8d   :  { %v103_v33 = vpop.permute.xlu1 %102 }
  0x90   :  { %v108_v26 = vpop.permute.xlu0 %107 }
  0x91   :  { %v113_v45 = vpop.permute.xlu1 %112 }
  0xe2   :  { %v652_v27 = vpop.f32.mrf.mxu0  ;;  %v656_v28 = vpop.f32.mrf.mxu1 }
  0xe3   :  { %v230_v29 = vadd.f32 %v652_v27, %v88_v23  ;;  %v246_v30 = vadd.f32 %v656_v28, %v108_v26 }
  0xe4   :  { %v221_v31 = vpop.f32.mrf.mxu0  ;;  %v237_v32 = vpop.f32.mrf.mxu1 }
  0xe5   :  { %v262_v34 = vmul.f32 0.2, %v230_v29  ;;  %v266_v35 = vmul.f32 0.2, %v246_v30  ;;  %v222_v36 = vadd.f32 %v221_v31, %v78_v21  ;;  %v238_v37 = vadd.f32 %v237_v32, %v98_v24  ;;  %v283_v24 = vld [vmem:[#allocation2 + $0x38] sm:$0xff]  ;;  %v281_v31 = vld [vmem:[#allocation2 + $0x28] sm:$0xff] }
  0xe6   :  { %v653_v38 = vpop.f32.mrf.mxu0  ;;  %vm258_vm0 = vcmp.ge.f32.partialorder %v246_v30, 0.0  ;;  %vm254_vm1 = vcmp.ge.f32.partialorder %v230_v29, 0.0  ;;  %v657_v44 = vpop.f32.mrf.mxu1  ;;  %v321_v32 = vld [vmem:[#allocation3 + $0x20] sm:$0xff] }
  0xe7   :  { %v260_v39 = vmul.f32 0.2, %v222_v36  ;;  %v264_v40 = vmul.f32 0.2, %v238_v37  ;;  %v233_v41 = vadd.f32 %v653_v38, %v93_v25  ;;  %v828_v42 = vsel %vm258_vm0, %v246_v30, %v266_v35  ;;  %v317_v25 = vld [vmem:[#allocation3] sm:$0xff] }
  0xe8   :  { %v830_v43 = vsel %vm254_vm1, %v230_v29, %v262_v34  ;;  %296 = vadd.xlane.f32.xlu1 %v828_v42  ;;  %vm256_vm2 = vcmp.ge.f32.partialorder %v238_v37, 0.0  ;;  %vm252_vm3 = vcmp.ge.f32.partialorder %v222_v36, 0.0  ;;  %v249_v47 = vadd.f32 %v657_v44, %v113_v45  ;;  %v240_v50 = vpop.f32.mrf.mxu1  ;;  %v224_v56 = vpop.f32.mrf.mxu0 }
  0xe9   :  { %288 = vadd.xlane.f32.xlu0 %v830_v43  ;;  %v263_v46 = vmul.f32 0.2, %v233_v41  ;;  %v834_v48 = vsel %vm256_vm2, %v238_v37, %v264_v40  ;;  %v836_v49 = vsel %vm252_vm3, %v222_v36, %v260_v39  ;;  %vm255_vm4 = vcmp.ge.f32.partialorder %v233_v41, 0.0  ;;  %v320_v39 = vld [vmem:[#allocation3 + $0x18] sm:$0xff]  ;;  %v277_v40 = vld [vmem:[#allocation2 + $0x8] sm:$0xff] }
  0xea   :  { %v327_v51 = vmul.f32 %v830_v43, %v830_v43  ;;  %v267_v52 = vmul.f32 0.2, %v249_v47  ;;  %v241_v53 = vadd.f32 %v240_v50, %v103_v33  ;;  %vm259_vm6 = vcmp.ge.f32.partialorder %v249_v47, 0.0 }
  0xeb   :  { %v842_v54 = vsel %vm255_vm4, %v233_v41, %v263_v46  ;;  %v325_v57 = vmul.f32 %v836_v49, %v836_v49  ;;  %v225_v59 = vadd.f32 %v224_v56, %v826_v22  ;;  %v329_v61 = vmul.f32 %v834_v48, %v834_v48  ;;  %v323_v56 = vld [vmem:[#allocation3 + $0x30] sm:$0xff] }
  0xec   :  { %292 = vadd.xlane.f32.xlu1 %v834_v48  ;;  %v265_v58 = vmul.f32 0.2, %v241_v53  ;;  %v864_v60 = vsel %vm259_vm6, %v249_v47, %v267_v52  ;;  %vm257_vm7 = vcmp.ge.f32.partialorder %v241_v53, 0.0  ;;  %v328_v0 = vmul.f32 %v842_v54, %v842_v54 }
  0xed   :  { %284 = vadd.xlane.f32.xlu0 %v836_v49  ;;  %v261_v62 = vmul.f32 0.2, %v225_v59  ;;  %vm253_vm8 = vcmp.ge.f32.partialorder %v225_v59, 0.0  ;;  %v331_v3 = vmul.f32 %v828_v42, %v828_v42  ;;  %v332_v5 = vmul.f32 %v864_v60, %v864_v60 }
  0xee   :  { %v869_v63 = vsel %vm257_vm7, %v241_v53, %v265_v58 }
  0xef   :  { %v874_v1 = vsel %vm253_vm8, %v225_v59, %v261_v62  ;;  %v330_v4 = vmul.f32 %v869_v63, %v869_v63 }
  0xf0   :  { %337 = vadd.xlane.f32.xlu1 %v327_v51  ;;  %v326_v2 = vmul.f32 %v874_v1, %v874_v1 }
  0xf1   :  { %290 = vadd.xlane.f32.xlu0 %v842_v54 }
  0xf4   :  { %333 = vadd.xlane.f32.xlu1 %v325_v57 }
  0xf5   :  { %298 = vadd.xlane.f32.xlu0 %v864_v60 }
  0xf8   :  { %341 = vadd.xlane.f32.xlu1 %v329_v61 }
  0xf9   :  { %294 = vadd.xlane.f32.xlu0 %v869_v63 }
  0xfc   :  { %286 = vadd.xlane.f32.xlu1 %v874_v1 }
  0xfd   :  { %339 = vadd.xlane.f32.xlu0 %v328_v0 }
 0x100   :  { %345 = vadd.xlane.f32.xlu1 %v331_v3 }
 0x101   :  { %335 = vadd.xlane.f32.xlu0 %v326_v2 }
 0x105   :  { %343 = vadd.xlane.f32.xlu0 %v330_v4 }
 0x109   :  { %347 = vadd.xlane.f32.xlu0 %v332_v5 }
 0x171   :  { %v297_v8 = vpop.xlane.xlu1 %296 }
 0x172   :  { %v289_v9 = vpop.xlane.xlu0 %288  ;;  %v306_v10 = vadd.f32 %v297_v8, %v282_v6  ;;  %v322_v6 = vld [vmem:[#allocation3 + $0x28] sm:$0xff] }
 0x173   :  { %v302_v11 = vadd.f32 %v289_v9, %v278_v7 }
 0x174   :  { %315 = vst.msk [vmem:[#allocation2 + $0x30] sm:$0xff] %vm26_vm5, %v306_v10 }
 0x175   :  { %311 = vst.msk [vmem:[#allocation2 + $0x10] sm:$0xff] %vm26_vm5, %v302_v11  ;;  %v293_v14 = vpop.xlane.xlu1 %292 }
 0x176   :  { %v285_v15 = vpop.xlane.xlu0 %284  ;;  %v304_v16 = vadd.f32 %v293_v14, %v280_v12 }
 0x177   :  { %v300_v17 = vadd.f32 %v285_v15, %v276_v13  ;;  %v324_v15 = vld [vmem:[#allocation3 + $0x38] sm:$0xff] }
 0x178   :  { %313 = vst.msk [vmem:[#allocation2 + $0x20] sm:$0xff] %vm26_vm5, %v304_v16 }
 0x179   :  { %309 = vst.msk [vmem:[#allocation2] sm:$0xff] %vm26_vm5, %v300_v17  ;;  %v338_v20 = vpop.xlane.xlu1 %337 }
 0x17a   :  { %v291_v21 = vpop.xlane.xlu0 %290  ;;  %v351_v22 = vadd.f32 %v338_v20, %v319_v18 }
 0x17b   :  { %v303_v23 = vadd.f32 %v291_v21, %v279_v19  ;;  %v384_v11 = vld [vmem:[#allocation2 + $0x30] sm:$0xff] }
 0x17c   :  { %359 = vst.msk [vmem:[#allocation3 + $0x10] sm:$0xff] %vm26_vm5, %v351_v22  ;;  %v380_v28 = vld [vmem:[#allocation2 + $0x10] sm:$0xff]  ;;  %v914_v19 = vmul.f32 0.0078125, %v384_v11 }
 0x17d   :  { %312 = vst.msk [vmem:[#allocation2 + $0x18] sm:$0xff] %vm26_vm5, %v303_v23  ;;  %v334_v27 = vpop.xlane.xlu1 %333  ;;  %v893_v33 = vmul.f32 0.0078125, %v380_v28 }
 0x17e   :  { %v299_v26 = vpop.xlane.xlu0 %298  ;;  %v349_v30 = vadd.f32 %v334_v27, %v317_v25 }
 0x17f   :  { %v307_v29 = vadd.f32 %v299_v26, %v283_v24  ;;  %v412_v45 = vmul.f32 %v893_v33, %v893_v33  ;;  %v382_v7 = vld [vmem:[#allocation2 + $0x20] sm:$0xff] }
 0x180   :  { %357 = vst.msk [vmem:[#allocation3] sm:$0xff] %vm26_vm5, %v349_v30  ;;  %v378_v36 = vld [vmem:[#allocation2] sm:$0xff]  ;;  %v909_v14 = vmul.f32 0.0078125, %v382_v7  ;;  %v416_v30 = vmul.f32 %v914_v19, %v914_v19 }
 0x181   :  { %316 = vst.msk [vmem:[#allocation2 + $0x38] sm:$0xff] %vm26_vm5, %v307_v29  ;;  %v342_v35 = vpop.xlane.xlu1 %341  ;;  %v899_v46 = vmul.f32 0.0078125, %v378_v36 }
 0x182   :  { %v295_v34 = vpop.xlane.xlu0 %294  ;;  %v353_v38 = vadd.f32 %v342_v35, %v321_v32  ;;  %v414_v24 = vmul.f32 %v909_v14, %v909_v14  ;;  %v428_v35 = vld [vmem:[%s1003_s3 + $0x10] sm:$0xff] }
 0x183   :  { %v305_v37 = vadd.f32 %v295_v34, %v281_v31  ;;  %v396_v41 = vld [vmem:[#allocation3 + $0x10] sm:$0xff]  ;;  %v410_v61 = vmul.f32 %v899_v46, %v899_v46 }
 0x184   :  { %361 = vst.msk [vmem:[#allocation3 + $0x20] sm:$0xff] %vm26_vm5, %v353_v38  ;;  %v404_v44 = vmul.f32 0.0078125, %v396_v41  ;;  %v381_v2 = vld [vmem:[#allocation2 + $0x18] sm:$0xff] }
 0x185   :  { %314 = vst.msk [vmem:[#allocation2 + $0x28] sm:$0xff] %vm26_vm5, %v305_v37  ;;  %v287_v50 = vpop.xlane.xlu1 %286  ;;  %v907_v9 = vmul.f32 0.0078125, %v381_v2 }
 0x186   :  { %v340_v47 = vpop.xlane.xlu0 %339  ;;  %v301_v52 = vadd.f32 %v287_v50, %v277_v40  ;;  %v420_v53 = vsub.f32 %v404_v44, %v412_v45 }
 0x187   :  { %v352_v51 = vadd.f32 %v340_v47, %v320_v39  ;;  %v394_v57 = vld [vmem:[#allocation3] sm:$0xff]  ;;  %v413_v18 = vmul.f32 %v907_v9, %v907_v9 }
 0x188   :  { %310 = vst.msk [vmem:[#allocation2 + $0x8] sm:$0xff] %vm26_vm5, %v301_v52  ;;  %v436_v58 = vadd.f32 1e-05, %v420_v53  ;;  %v402_v59 = vmul.f32 0.0078125, %v394_v57  ;;  %v385_v32 = vld [vmem:[#allocation2 + $0x38] sm:$0xff]  ;;  %v426_v52 = vld [vmem:[%s1003_s3] sm:$0xff] }
 0x189   :  { %360 = vst.msk [vmem:[#allocation3 + $0x18] sm:$0xff] %vm26_vm5, %v352_v51  ;;  %v346_v0 = vpop.xlane.xlu1 %345  ;;  %v928_v40 = vmul.f32 0.0078125, %v385_v32  ;;  %v458_v32 = vld [vmem:[%s1004_s4] sm:$0xff] }
 0x18a   :  { %v336_v62 = vpop.xlane.xlu0 %335  ;;  %v355_v4 = vadd.f32 %v346_v0, %v323_v56  ;;  %693 = vrsqrt.f32 %v436_v58  ;;  %v418_v5 = vsub.f32 %v402_v59, %v410_v61 }
 0x18b   :  { %v350_v3 = vadd.f32 %v336_v62, %v318_v55  ;;  %v398_v12 = vld [vmem:[#allocation3 + $0x20] sm:$0xff]  ;;  %v417_v58 = vmul.f32 %v928_v40, %v928_v40 }
 0x18c   :  { %363 = vst.msk [vmem:[#allocation3 + $0x30] sm:$0xff] %vm26_vm5, %v355_v4  ;;  %v434_v8 = vadd.f32 1e-05, %v418_v5  ;;  %v406_v20 = vmul.f32 0.0078125, %v398_v12  ;;  %v383_v27 = vld [vmem:[#allocation2 + $0x28] sm:$0xff] }
 0x18d   :  { %358 = vst.msk [vmem:[#allocation3 + $0x8] sm:$0xff] %vm26_vm5, %v350_v3  ;;  %v926_v38 = vmul.f32 0.0078125, %v383_v27 }
 0x18e   :  { %v344_v10 = vpop.xlane.xlu0 %343  ;;  %695 = vrsqrt.f32 %v434_v8  ;;  %v422_v31 = vsub.f32 %v406_v20, %v414_v24  ;;  %v433_v20 = vld [vmem:[%s1003_s3 + $0x38] sm:$0xff] }
 0x18f   :  { %v354_v13 = vadd.f32 %v344_v10, %v322_v6  ;;  %v379_v25 = vld [vmem:[#allocation2 + $0x8] sm:$0xff]  ;;  %v415_v55 = vmul.f32 %v926_v38, %v926_v38  ;;  %v429_v6 = vld [vmem:[%s1003_s3 + $0x18] sm:$0xff]  ;;  %v432_v10 = vld [vmem:[%s1003_s3 + $0x30] sm:$0xff] }
 0x190   :  { %v397_v16 = vld [vmem:[#allocation3 + $0x18] sm:$0xff]  ;;  %v924_v36 = vmul.f32 0.0078125, %v379_v25  ;;  %v438_v50 = vadd.f32 1e-05, %v422_v31 }
 0x191   :  { %362 = vst.msk [vmem:[#allocation3 + $0x28] sm:$0xff] %vm26_vm5, %v354_v13  ;;  %v405_v17 = vmul.f32 0.0078125, %v397_v16  ;;  %v461_v31 = vld [vmem:[%s1004_s4 + $0x18] sm:$0xff] }
 0x192   :  { %v348_v21 = vpop.xlane.xlu0 %347  ;;  %v411_v53 = vmul.f32 %v924_v36, %v924_v36 }
 0x193   :  { %v356_v22 = vadd.f32 %v348_v21, %v324_v15  ;;  %v421_v23 = vsub.f32 %v405_v17, %v413_v18  ;;  %v400_v26 = vld [vmem:[#allocation3 + $0x30] sm:$0xff]  ;;  %v430_v15 = vld [vmem:[%s1003_s3 + $0x20] sm:$0xff] }
 0x194   :  { %v408_v29 = vmul.f32 0.0078125, %v400_v26  ;;  %v395_v34 = vld [vmem:[#allocation3 + $0x8] sm:$0xff]  ;;  %v460_v18 = vld [vmem:[%s1004_s4 + $0x10] sm:$0xff] }
 0x195   :  { %364 = vst.msk [vmem:[#allocation3 + $0x38] sm:$0xff] %vm26_vm5, %v356_v22  ;;  %v437_v28 = vadd.f32 1e-05, %v421_v23  ;;  %v403_v41 = vmul.f32 0.0078125, %v395_v34  ;;  %v427_v26 = vld [vmem:[%s1003_s3 + $0x8] sm:$0xff] }
 0x196   :  { %v424_v37 = vsub.f32 %v408_v29, %v416_v30 }
 0x197   :  { %697 = vrsqrt.f32 %v437_v28  ;;  %v694_v39 = vpop.eup %693  ;;  %v419_v59 = vsub.f32 %v403_v41, %v411_v53 }
 0x198   :  { %v399_v44 = vld [vmem:[#allocation3 + $0x28] sm:$0xff]  ;;  %v452_v45 = vmul.f32 %v694_v39, %v428_v35  ;;  %v440_v47 = vadd.f32 1e-05, %v424_v37 }
 0x199   :  { %v407_v51 = vmul.f32 0.0078125, %v399_v44  ;;  %v435_v3 = vadd.f32 1e-05, %v419_v59 }
 0x19a   :  { %502 = vperm.xlu1 %680, %v452_v45   ;;  %699 = vrsqrt.f32 %v440_v47  ;;  %v468_v17 = vmul.f32 %v452_v45, %v893_v33  ;;  %v431_v33 = vld [vmem:[%s1003_s3 + $0x28] sm:$0xff] }
 0x19b   :  { %v696_v56 = vpop.eup %695  ;;  %701 = vrsqrt.f32 %v438_v50  ;;  %v423_v0 = vsub.f32 %v407_v51, %v415_v55 }
 0x19c   :  { %v401_v57 = vld [vmem:[#allocation3 + $0x38] sm:$0xff]  ;;  %v450_v61 = vmul.f32 %v696_v56, %v426_v52  ;;  %v476_v23 = vsub.f32 %v460_v18, %v468_v17 }
 0x19d   :  { %v409_v62 = vmul.f32 0.0078125, %v401_v57  ;;  %v439_v5 = vadd.f32 1e-05, %v423_v0 }
 0x19e   :  { %492 = vperm.xlu1 %680, %v450_v61   ;;  %v466_v30 = vmul.f32 %v450_v61, %v899_v46  ;;  %v459_v46 = vld [vmem:[%s1004_s4 + $0x8] sm:$0xff] }
 0x19f   :  { %v425_v2 = vsub.f32 %v409_v62, %v417_v58 }
 0x1a0   :  { %v474_v35 = vsub.f32 %v458_v32, %v466_v30 }
 0x1a1   :  { %v441_v4 = vadd.f32 1e-05, %v425_v2 }
 0x1a3   :  { %703 = vrsqrt.f32 %v441_v4 }
 0x1a4   :  { %v698_v7 = vpop.eup %697  ;;  %705 = vrsqrt.f32 %v435_v3 }
 0x1a5   :  { %v453_v8 = vmul.f32 %v698_v7, %v429_v6  ;;  %707 = vrsqrt.f32 %v439_v5 }
 0x1a7   :  { %507 = vperm.xlu1 %680, %v453_v8   ;;  %v700_v11 = vpop.eup %699  ;;  %v469_v29 = vmul.f32 %v453_v8, %v907_v9  ;;  %v462_v9 = vld [vmem:[%s1004_s4 + $0x20] sm:$0xff] }
 0x1a8   :  { %v456_v12 = vmul.f32 %v700_v11, %v432_v10  ;;  %v702_v13 = vpop.eup %701 }
 0x1a9   :  { %v454_v16 = vmul.f32 %v702_v13, %v430_v15  ;;  %v477_v34 = vsub.f32 %v461_v31, %v469_v29 }
 0x1aa   :  { %522 = vperm.xlu0 %679, %v456_v12   ;;  %v472_v47 = vmul.f32 %v456_v12, %v914_v19 }
 0x1ab   :  { %v470_v39 = vmul.f32 %v454_v16, %v909_v14  ;;  %v463_v14 = vld [vmem:[%s1004_s4 + $0x28] sm:$0xff] }
 0x1ad   :  { %v478_v44 = vsub.f32 %v462_v9, %v470_v39 }
 0x1ae   :  { %512 = vperm.xlu0 %679, %v454_v16  }
 0x1b0   :  { %v704_v21 = vpop.eup %703 }
 0x1b1   :  { %v706_v22 = vpop.eup %705  ;;  %v457_v24 = vmul.f32 %v704_v21, %v433_v20 }
 0x1b2   :  { %v708_v25 = vpop.eup %707  ;;  %550 = vperm.xlu0 %679, %v476_v23   ;;  %v451_v27 = vmul.f32 %v706_v22, %v427_v26 }
 0x1b3   :  { %527 = vperm.xlu1 %680, %v457_v24   ;;  %v455_v28 = vmul.f32 %v708_v25, %v431_v33  ;;  %v473_v52 = vmul.f32 %v457_v24, %v928_v40 }
 0x1b4   :  { %v467_v37 = vmul.f32 %v451_v27, %v924_v36  ;;  %v464_v36 = vld [vmem:[%s1004_s4 + $0x30] sm:$0xff] }
 0x1b5   :  { %v471_v45 = vmul.f32 %v455_v28, %v926_v38  ;;  %v480_v51 = vsub.f32 %v464_v36, %v472_v47  ;;  %v465_v38 = vld [vmem:[%s1004_s4 + $0x38] sm:$0xff]  ;;  %s733_s4 = smov [#allocation4]  }
 0x1b6   :  { %497 = vperm.xlu0 %679, %v451_v27   ;;  %v475_v41 = vsub.f32 %v459_v46, %v467_v37  ;;  %v481_v19 = vsub.f32 %v465_v38, %v473_v52  ;;  %s599_s8 = sshll.u32 %s733_s4, 4  ;;  %s600_s8 = int_to_ptr.vmem [resolvable:$true] %s599_s8 }
 0x1b7   :  { %517 = vperm.xlu1 %680, %v455_v28   ;;  %v479_v50 = vsub.f32 %v463_v14, %v471_v45  ;;  %s709_s9 = scalar_lea.vmem %s600_s8, 1024  ;;  %p714_p1 = scmp.lt.s32.totalorder %s600_s8, %s600_s8 }
 0x1b8   :  { %p710_p0 = scmp.ne.s32.totalorder %s600_s8, %s709_s9  ;;  %p715_p2 = scmp.lt.s32.totalorder %s709_s9, %s709_s9 }
 0x1ba   :  { %540 = vperm.xlu0 %679, %v474_v35   ;;  %p716_p3 = por %p715_p2, %p714_p1 }
 0x1bb   :  { %555 = vperm.xlu1 %680, %v477_v34  }
 0x1bc   :  { %p717_p4 = pnand %p716_p3, %p710_p0 }
 0x1be   :  { %560 = vperm.xlu0 %679, %v478_v44  }
 0x1bf   :  { %545 = vperm.xlu1 %680, %v475_v41  }
 0x1c2   :  { %570 = vperm.xlu0 %679, %v480_v51  }
 0x1c3   :  { %565 = vperm.xlu1 %680, %v479_v50  }
 0x1c7   :  { %575 = vperm.xlu1 %680, %v481_v19  }
 0x215   :  { %v503_v53 = vpop.permute.xlu1 %502 }
 0x216   :  { %v532_v59 = vmul.f32 %v503_v53, %v830_v43 }
 0x219   :  { %v493_v55 = vpop.permute.xlu1 %492 }
 0x21a   :  { %v530_v3 = vmul.f32 %v493_v55, %v836_v49 }
 0x222   :  { %v508_v57 = vpop.permute.xlu1 %507 }
 0x223   :  { %v533_v4 = vmul.f32 %v508_v57, %v842_v54 }
 0x225   :  { %v523_v56 = vpop.permute.xlu0 %522 }
 0x226   :  { %v536_v16 = vmul.f32 %v523_v56, %v828_v42 }
 0x229   :  { %v513_v58 = vpop.permute.xlu0 %512 }
 0x22a   :  { %v534_v10 = vmul.f32 %v513_v58, %v834_v48 }
 0x22d   :  { %v551_v61 = vpop.permute.xlu0 %550 }
 0x22e   :  { %v528_v62 = vpop.permute.xlu1 %527  ;;  %v580_v0 = vadd.f32 %v551_v61, %v532_v59 }
 0x22f   :  { %v537_v48 = vmul.f32 %v528_v62, %v864_v60 }
 0x230   :  { %588 = vst [vmem:[#allocation4 + $0x10] sm:$0xff] %v580_v0 }
 0x231   :  { %v498_v40 = vpop.permute.xlu0 %497 }
 0x232   :  { %v518_v2 = vpop.permute.xlu1 %517  ;;  %v531_v11 = vmul.f32 %v498_v40, %v874_v1 }
 0x233   :  { %v535_v49 = vmul.f32 %v518_v2, %v869_v63 }
 0x235   :  { %v541_v6 = vpop.permute.xlu0 %540 }
 0x236   :  { %v556_v5 = vpop.permute.xlu1 %555  ;;  %v578_v8 = vadd.f32 %v541_v6, %v530_v3 }
 0x237   :  { %v581_v7 = vadd.f32 %v556_v5, %v533_v4 }
 0x238   :  { %586 = vst [vmem:[#allocation4] sm:$0xff] %v578_v8 }
 0x239   :  { %589 = vst [vmem:[#allocation4 + $0x18] sm:$0xff] %v581_v7  ;;  %v561_v12 = vpop.permute.xlu0 %560 }
 0x23a   :  { %v546_v43 = vpop.permute.xlu1 %545  ;;  %v582_v15 = vadd.f32 %v561_v12, %v534_v10 }
 0x23b   :  { %v579_v13 = vadd.f32 %v546_v43, %v531_v11 }
 0x23c   :  { %590 = vst [vmem:[#allocation4 + $0x20] sm:$0xff] %v582_v15 }
 0x23d   :  { %587 = vst [vmem:[#allocation4 + $0x8] sm:$0xff] %v579_v13  ;;  %v571_v17 = vpop.permute.xlu0 %570 }
 0x23e   :  { %v566_v54 = vpop.permute.xlu1 %565  ;;  %v584_v20 = vadd.f32 %v571_v17, %v536_v16 }
 0x23f   :  { %v583_v18 = vadd.f32 %v566_v54, %v535_v49 }
 0x240   :  { %592 = vst [vmem:[#allocation4 + $0x30] sm:$0xff] %v584_v20 }
 0x241   :  { %591 = vst [vmem:[#allocation4 + $0x28] sm:$0xff] %v583_v18 }
 0x242   :  { %v576_v1 = vpop.permute.xlu1 %575 }
 0x243   :  { %v585_v21 = vadd.f32 %v576_v1, %v537_v48 }
 0x245   :  { %593 = vst [vmem:[#allocation4 + $0x38] sm:$0xff] %v585_v21 }
 0x246   :  { %720 = shalt.err (!%p717_p4)
}
 0x247   :  { %s734_s10 = smov 128   ;;  %s735_s11 = smov 8  }
 0x248   :  { %605 = dma.vmem_to_hbm [thread:$0]  %s600_s8, 1024, %s1005_s5, [#allocation5], %s734_s10, %s734_s10, %s735_s11  }
 0x249   :  { %729 = dma.done.wait [#allocation5], 1024  }
 0x24a   :  { %730 = vsyncadd [#allocation5], 4294966272 }
 0x24b   :  { %609 = vsyncpa [#allocation5], 1 }

</bundles_post_ra>
